<compile_context>
chip_gen: v7x
topology: tpu7x:2x2x1
jax: 0.10.0
libtpu: 0.0.40
codegen_flags: <defaults>
</compile_context>

<pallas_src>
import math
import functools

import jax
import jax.numpy as jnp
from jax.experimental import pallas as pl
from jax.experimental.pallas import tpu as pltpu


# --------------------------------------------------------------------------------------
# Chip-aware planning helpers
# --------------------------------------------------------------------------------------
def _tpu_vmem_capacity_bytes():
    try:
        return int(pltpu.get_tpu_info().vmem_capacity_bytes)
    except Exception:
        return 64 << 20  # conservative fallback (v7x per-TensorCore VMEM)


def _default_chain_dtype():
    """bf16 elementwise chain on bf16-native VPU/EUP generations (v6e, v7x); f32 on <= v5."""
    try:
        kind = jax.devices()[0].device_kind.lower()
    except Exception:
        return jnp.float32
    for old in ("v2", "v3", "v4", "v5"):
        if old in kind:
            return jnp.float32
    return jnp.bfloat16


def _round_up(x, m):
    return -(-x // m) * m


def _tile_vmem_bytes(rows, cols, itemsize):
    # VMEM tiles pad to (8 sublanes, 128 lanes).
    return _round_up(max(rows, 1), 8) * _round_up(max(cols, 1), 128) * itemsize


def _l_block_candidates(L):
    cands = {d for d in range(8, min(L, 1024) + 1, 8) if L % d == 0}
    if L <= 1024:
        cands.add(L)          # block == full dim is always layout-legal
    if not cands:
        cands.add(L)          # ragged L with no 8-multiple divisor: single full-L tile
    return sorted(cands, reverse=True)


def _resident_vmem_estimate(lb, S, H, E, D, in_b, out_b, ch_b):
    # double-buffered q/out tiles, double-buffered per-batch-resident k/v/w,
    # ~5 live (Lt, S) intermediates (2x f32 scores + exp chain), per-head f32 partials.
    return (2 * _tile_vmem_bytes(lb, H * E, in_b)
            + 2 * _tile_vmem_bytes(lb, H * D, out_b)
            + 2 * (_tile_vmem_bytes(S, H * E, in_b)
                   + _tile_vmem_bytes(S, H * D, in_b)
                   + _tile_vmem_bytes(S, H * E, 4))
            + lb * _round_up(S, 128) * (2 * 4 + 3 * ch_b)
            + H * lb * _round_up(D, 128) * 4)


def _streamed_vmem_estimate(lb, H, E, D, in_b, out_b, ch_b):
    # double-buffered q/k/v/w chunks + out tile, (Lt, Lt) intermediates, fro/acc/den scratch.
    return (2 * (2 * _tile_vmem_bytes(lb, H * E, in_b)
                 + _tile_vmem_bytes(lb, H * D, in_b)
                 + _tile_vmem_bytes(lb, H * E, 4)
                 + _tile_vmem_bytes(lb, H * D, out_b))
            + lb * _round_up(lb, 128) * (2 * 4 + 3 * ch_b)
            + _tile_vmem_bytes(lb, H * E, 4)
            + _tile_vmem_bytes(lb, H * D, 4)
            + _tile_vmem_bytes(lb, H, 4)
            + H * lb * _round_up(D, 128) * 4)


def _plan_tiling(B, L, S, H, E, D, in_b, out_b, ch_b, l_block, force_streamed):
    vmem_cap = _tpu_vmem_capacity_bytes()
    budget = max(4 << 20, min(int(0.40 * vmem_cap), 48 << 20))

    if l_block is not None:
        if L % l_block != 0 or not (l_block % 8 == 0 or l_block == L):
            raise ValueError("l_block must divide L and be a multiple of 8 (or equal L)")
        cands = [l_block]
    else:
        cands = _l_block_candidates(L)

    streamed = bool(force_streamed)
    lb = None
    if not streamed:
        for c in cands:
            if _resident_vmem_estimate(c, S, H, E, D, in_b, out_b, ch_b) <= budget:
                lb = c
                break
        if lb is None:                 # full-S residency does not fit: stream over S instead
            streamed = True
    if streamed:
        for c in cands:
            if _streamed_vmem_estimate(c, H, E, D, in_b, out_b, ch_b) <= budget:
                lb = c
                break
        if lb is None:
            lb = cands[-1]

    # v7x has two TensorCores: make sure the parallel part of the grid has >= 2 steps.
    if l_block is None and B * (L // lb) < 2:
        smaller = [c for c in cands if c < lb]
        if smaller:
            lb = smaller[0]

    vmem_limit = max(32 << 20, int(0.70 * vmem_cap))
    return lb, streamed, vmem_limit


# --------------------------------------------------------------------------------------
# Pallas kernels: FullAttention_new inner attention
# --------------------------------------------------------------------------------------
def _pv_dtype(chain_dtype, v_dtype):
    if chain_dtype == jnp.bfloat16 or v_dtype == jnp.bfloat16:
        return jnp.bfloat16
    return v_dtype


def _head_exp_weights(qe_scaled, ke, fro_scaled, we, chain_dtype):
    """exp(tanh(q.k^T) * sigmoid(fro.w^T)) for one head.

    scale is already folded into the (Lt, E)-sized operands.  sg = tanh*sigmoid lies in
    (-1, 1), so exp(sg) is in [1/e, e]: no max-stabilization pass is needed.
    """
    s1 = jax.lax.dot_general(qe_scaled, ke, (((1,), (1,)), ((), ())),
                             preferred_element_type=jnp.float32).astype(chain_dtype)
    s2 = jax.lax.dot_general(fro_scaled, we, (((1,), (1,)), ((), ())),
                             preferred_element_type=jnp.float32).astype(chain_dtype)
    return jnp.exp(jnp.tanh(s1) * jax.nn.sigmoid(s2))


def _attn_resident_kernel(q_ref, k_ref, v_ref, w_ref, o_ref, *,
                          scale, H, E, D, l_block, chain_dtype):
    """One (batch, query_tile) grid step; full k/v/w resident per batch.

    q_ref: (1, Lt, H*E)   k_ref: (1, S, H*E)   v_ref: (1, S, H*D)
    w_ref: (S, H*E)       o_ref: (1, Lt, H*D)
    """
    q_all = q_ref[0]                                              # (Lt, H*E)
    # Keys at the *query* rows for fro_norm (L == S), sliced from the already-resident
    # full-k block instead of a second HBM stream.
    row0 = pl.multiple_of(pl.program_id(1) * l_block, l_block)
    kq_all = k_ref[0, pl.ds(row0, l_block), :]                    # (Lt, H*E)
    k_all = k_ref[0]                                              # (S,  H*E)
    v_all = v_ref[0]                                              # (S,  H*D)
    w_all = w_ref[...]                                            # (S,  H*E)
    pv_dt = _pv_dtype(chain_dtype, v_all.dtype)

    outs = []
    # H is small & static: fully unrolled at trace time, one fused (Lt, H*D) store below.
    for h in range(H):
        sl_e = slice(h * E, (h + 1) * E)
        sl_d = slice(h * D, (h + 1) * D)
        q_raw = q_all[:, sl_e]
        qe = q_raw * scale                                        # scale folded into (Lt,E)
        fro = (jnp.abs(q_raw) + jnp.abs(kq_all[:, sl_e])) * scale
        e = _head_exp_weights(qe, k_all[:, sl_e], fro,
                              w_all[:, sl_e].astype(qe.dtype), chain_dtype)      # (Lt, S)
        den = jnp.sum(e.astype(jnp.float32), axis=-1, keepdims=True)             # (Lt, 1)
        num = jnp.dot(e.astype(pv_dt), v_all[:, sl_d].astype(pv_dt),
                      preferred_element_type=jnp.float32)                        # (Lt, D)
        outs.append(num * pl.reciprocal(den, approx=True))
    o_ref[0] = jnp.concatenate(outs, axis=-1).astype(o_ref.dtype)


def _attn_streamed_kernel(q_ref, k_ref, v_ref, w_ref, o_ref,
                          fro_ref, acc_ref, den_ref, *,
                          scale, H, E, D, chain_dtype):
    """Flash-style S-streamed variant: grid (batch, query_tile, s_chunk), s_chunk == l_block.

    The k/v/w chunk index is rotated so that at s == 0 the chunk *is* the query rows
    (L == S), giving fro_norm with no extra HBM stream.  exp(sg) is bounded, so a plain
    running sum (no running max) is exact.
    """
    s = pl.program_id(2)
    n_s = pl.num_programs(2)
    q_all = q_ref[0]          # (Lt, H*E)
    k_all = k_ref[0]          # (Lt, H*E) chunk; equals keys at the query rows when s == 0
    v_all = v_ref[0]          # (Lt, H*D) chunk
    w_all = w_ref[...]        # (Lt, H*E) chunk
    pv_dt = _pv_dtype(chain_dtype, v_all.dtype)

    @pl.when(s == 0)
    def _():
        fro_ref[...] = ((jnp.abs(q_all) + jnp.abs(k_all)) * scale).astype(jnp.float32)
        acc_ref[...] = jnp.zeros_like(acc_ref)
        den_ref[...] = jnp.zeros_like(den_ref)

    fro_all = fro_ref[...]
    nums, dens = [], []
    for h in range(H):
        sl_e = slice(h * E, (h + 1) * E)
        sl_d = slice(h * D, (h + 1) * D)
        qe = q_all[:, sl_e] * scale
        e = _head_exp_weights(qe, k_all[:, sl_e], fro_all[:, sl_e],
                              w_all[:, sl_e].astype(jnp.float32), chain_dtype)   # (Lt, Sk)
        dens.append(jnp.sum(e.astype(jnp.float32), axis=-1, keepdims=True))
        nums.append(jnp.dot(e.astype(pv_dt), v_all[:, sl_d].astype(pv_dt),
                            preferred_element_type=jnp.float32))
    acc_ref[...] += jnp.concatenate(nums, axis=-1)        # (Lt, H*D) f32 numerator
    den_ref[...] += jnp.concatenate(dens, axis=-1)        # (Lt, H)   f32 denominator

    @pl.when(s == n_s - 1)
    def _():
        outs = []
        for h in range(H):
            inv = pl.reciprocal(den_ref[:, h:h + 1], approx=True)
            outs.append(acc_ref[:, h * D:(h + 1) * D] * inv)
        o_ref[0] = jnp.concatenate(outs, axis=-1).astype(o_ref.dtype)


def full_attention_new(queries, keys, values, w, scale=None, l_block=None,
                       compute_dtype=None, force_streamed=False):
    """queries: (B, L, H, E), keys: (B, S, H, E), values: (B, S, H, D), w: (1, len, H, 2H).
    Returns V: (B, L, H, D)."""
    B, L, H, E = queries.shape
    _, S, _, D = values.shape
    assert keys.shape == (B, S, H, E)
    assert L == S, "torch.stack((queries, keys), -1) requires L == S"
    assert w.shape == (1, S, H, E), "module requires len == S and E == 2 * n_heads"
    scale = float(scale if scale is not None else 1.0 / math.sqrt(E))
    chain_dtype = jnp.dtype(compute_dtype if compute_dtype is not None
                            else _default_chain_dtype())

    # Free trailing-dim reshapes only -- no HBM transposes.
    q2 = queries.reshape(B, L, H * E)
    k2 = keys.reshape(B, S, H * E)
    v2 = values.reshape(B, S, H * D)
    w2 = w.reshape(S, H * E)

    in_b = jnp.dtype(queries.dtype).itemsize
    lb, streamed, vmem_limit = _plan_tiling(B, L, S, H, E, D, in_b, in_b,
                                            chain_dtype.itemsize, l_block, force_streamed)
    n_l = L // lb
    out_shape = jax.ShapeDtypeStruct((B, L, H * D), queries.dtype)
    # NOTE: for realistic configs (H >= 8) H*D = d_model = 2H^2 >= 128, so the output block
    # is already lane-dense; no in-kernel relayout is attempted when H*D < 128.

    if not streamed:
        kernel = functools.partial(_attn_resident_kernel, scale=scale, H=H, E=E, D=D,
                                   l_block=lb, chain_dtype=chain_dtype)
        out = pl.pallas_call(
            kernel,
            out_shape=out_shape,
            grid_spec=pltpu.PrefetchScalarGridSpec(
                num_scalar_prefetch=0,
                grid=(B, n_l),
                in_specs=[
                    pl.BlockSpec((1, lb, H * E), lambda b, i: (b, i, 0)),   # q tile
                    pl.BlockSpec((1, S, H * E), lambda b, i: (b, 0, 0)),    # full k (per batch)
                    pl.BlockSpec((1, S, H * D), lambda b, i: (b, 0, 0)),    # full v (per batch)
                    pl.BlockSpec((S, H * E), lambda b, i: (0, 0)),          # w (grid-resident)
                ],
                out_specs=pl.BlockSpec((1, lb, H * D), lambda b, i: (b, i, 0)),
            ),
            compiler_params=pltpu.CompilerParams(
                dimension_semantics=("parallel", "parallel"),
                vmem_limit_bytes=vmem_limit),
        )(q2, k2, v2, w2)
    else:
        n_s = n_l   # s_chunk == l_block so the rotated chunk at s == 0 is the query rows
        kernel = functools.partial(_attn_streamed_kernel, scale=scale, H=H, E=E, D=D,
                                   chain_dtype=chain_dtype)
        out = pl.pallas_call(
            kernel,
            out_shape=out_shape,
            grid_spec=pltpu.PrefetchScalarGridSpec(
                num_scalar_prefetch=0,
                grid=(B, n_l, n_s),
                in_specs=[
                    pl.BlockSpec((1, lb, H * E), lambda b, i, s: (b, i, 0)),            # q tile
                    pl.BlockSpec((1, lb, H * E), lambda b, i, s: (b, (i + s) % n_s, 0)),  # k chunk
                    pl.BlockSpec((1, lb, H * D), lambda b, i, s: (b, (i + s) % n_s, 0)),  # v chunk
                    pl.BlockSpec((lb, H * E), lambda b, i, s: ((i + s) % n_s, 0)),        # w chunk
                ],
                out_specs=pl.BlockSpec((1, lb, H * D), lambda b, i, s: (b, i, 0)),
                scratch_shapes=[pltpu.VMEM((lb, H * E), jnp.float32),   # fro at the query rows
                                pltpu.VMEM((lb, H * D), jnp.float32),   # numerator accumulator
                                pltpu.VMEM((lb, H), jnp.float32)],      # denominator accumulator
            ),
            compiler_params=pltpu.CompilerParams(
                dimension_semantics=("parallel", "parallel", "arbitrary"),
                vmem_limit_bytes=vmem_limit),
        )(q2, k2, v2, w2)

    return out.reshape(B, L, H, D)


# --------------------------------------------------------------------------------------
# CrossAttentionLayer forward (projections in plain JAX around the Pallas attention)
# --------------------------------------------------------------------------------------
def init_cross_attention_params(key, d_model, n_heads, length, d_keys=None, d_values=None):
    d_keys = d_keys or d_model // n_heads
    d_values = d_values or d_model // n_heads
    ks = jax.random.split(key, 9)

    def _linear(kw, kb, fan_in, fan_out):
        bound = 1.0 / math.sqrt(fan_in)
        wgt = jax.random.uniform(kw, (fan_in, fan_out), jnp.float32, -bound, bound)
        b = jax.random.uniform(kb, (fan_out,), jnp.float32, -bound, bound)
        return wgt, b

    wq, bq = _linear(ks[0], ks[1], d_model, d_keys * n_heads)
    wk, bk = _linear(ks[2], ks[3], d_model, d_keys * n_heads)
    wv, bv = _linear(ks[4], ks[5], d_model, d_values * n_heads)
    wo, bo = _linear(ks[6], ks[7], d_values * n_heads, d_model)

    # FullAttention_new mixing weight: xavier_uniform_(gain=1.0) on (1, len, H, 2H)
    fan_in_w = length * n_heads * (2 * n_heads)
    fan_out_w = 1 * n_heads * (2 * n_heads)
    bw = math.sqrt(6.0 / (fan_in_w + fan_out_w))
    w_attn = jax.random.uniform(ks[8], (1, length, n_heads, 2 * n_heads),
                                jnp.float32, -bw, bw)
    return dict(wq=wq, bq=bq, wk=wk, bk=bk, wv=wv, bv=bv, wo=wo, bo=bo, w_attn=w_attn)


def cross_attention_layer(params, queries, keys, values, n_heads, mix=False, scale=None,
                          compute_dtype=None):
    """queries: (B, L, d_model), keys/values: (B, S, d_model). Returns (out, attn=None)."""
    B, L, _ = queries.shape
    _, S, _ = keys.shape
    H = n_heads
    q = (queries @ params["wq"] + params["bq"]).reshape(B, L, H, -1)
    k = (keys @ params["wk"] + params["bk"]).reshape(B, S, H, -1)
    v = (values @ params["wv"] + params["bv"]).reshape(B, S, H, -1)

    out = full_attention_new(q, k, v, params["w_attn"], scale=scale,
                             compute_dtype=compute_dtype)            # (B, L, H, d_v)
    if mix:
        out = jnp.transpose(out, (0, 2, 1, 3))
    out = out.reshape(B, L, -1)
    out = out @ params["wo"] + params["bo"]
    return out, None


# --------------------------------------------------------------------------------------
# Pure-JAX references
# --------------------------------------------------------------------------------------
def _attention_reference(queries, keys, values, w, scale=None):
    B, L, H, E = queries.shape
    scale = scale if scale is not None else 1.0 / math.sqrt(E)
    scores = jnp.einsum('blhe,bshe->bhls', queries, keys)
    fro = jnp.abs(queries) + jnp.abs(keys)
    scores2 = jnp.einsum('blhe,bshe->bhls', fro,
                         jnp.broadcast_to(w, (B,) + w.shape[1:]))
    sg = jnp.tanh(scale * scores) * jax.nn.sigmoid(scale * scores2)
    a = jax.nn.softmax(sg, axis=-1)
    return jnp.einsum('bhls,bshd->blhd', a, values)


def _layer_reference(params, queries, keys, values, n_heads, mix=False, scale=None):
    B, L, _ = queries.shape
    _, S, _ = keys.shape
    H = n_heads
    q = (queries @ params["wq"] + params["bq"]).reshape(B, L, H, -1)
    k = (keys @ params["wk"] + params["bk"]).reshape(B, S, H, -1)
    v = (values @ params["wv"] + params["bv"]).reshape(B, S, H, -1)
    out = _attention_reference(q, k, v, params["w_attn"], scale=scale)
    if mix:
        out = jnp.transpose(out, (0, 2, 1, 3))
    out = out.reshape(B, L, -1)
    return out @ params["wo"] + params["bo"], None


if __name__ == "__main__":
    # Small shapes consistent with the module: d_keys = d_model // n_heads must equal 2*n_heads
    # (FullAttention_new needs E == 2H), so d_model = 2*H*H; len == L == S.
    B, L, H = 2, 16, 4
    d_model = 2 * H * H          # 32 -> E = D = 8
    S = L

    key = jax.random.PRNGKey(0)
    kp, kq, kk, kv = jax.random.split(key, 4)
    params = init_cross_attention_params(kp, d_model, H, L)
    queries = jax.random.normal(kq, (B, L, d_model), dtype=jnp.float32)
    keys_in = jax.random.normal(kk, (B, S, d_model), dtype=jnp.float32)
    values = jax.random.normal(kv, (B, S, d_model), dtype=jnp.float32)

    # 1) Full CrossAttentionLayer forward, auto (chip-dependent) elementwise-chain precision.
    out, attn = cross_attention_layer(params, queries, keys_in, values, H)
    out = jax.block_until_ready(out)
    ref, _ = _layer_reference(params, queries, keys_in, values, H)
    auto_bf16 = jnp.dtype(_default_chain_dtype()) == jnp.bfloat16
    tol = 5e-2 if auto_bf16 else 2e-3
    assert out.shape == (B, L, d_model)
    assert jnp.allclose(out, ref, atol=tol, rtol=tol), "layer mismatch vs reference"

    # Head-split inputs for testing the inner-attention kernel paths directly.
    qh = (queries @ params["wq"] + params["bq"]).reshape(B, L, H, -1)
    kh = (keys_in @ params["wk"] + params["bk"]).reshape(B, S, H, -1)
    vh = (values @ params["wv"] + params["bv"]).reshape(B, S, H, -1)
    v_ref = _attention_reference(qh, kh, vh, params["w_attn"])

    # 2) Resident path, strict f32 elementwise chain.
    v_out = jax.block_until_ready(
        full_attention_new(qh, kh, vh, params["w_attn"], compute_dtype=jnp.float32))
    assert v_out.shape == (B, L, H, d_model // H)
    assert jnp.allclose(v_out, v_ref, atol=2e-3, rtol=2e-3), "resident f32 mismatch"

    # 3) Resident path, bf16 elementwise chain (the v6e/v7x configuration).
    v_bf = jax.block_until_ready(
        full_attention_new(qh, kh, vh, params["w_attn"], compute_dtype=jnp.bfloat16))
    assert jnp.allclose(v_bf, v_ref, atol=5e-2, rtol=5e-2), "resident bf16 mismatch"

    # 4) S-streamed (flash-style) path, forced at a small chunk size.
    v_st = jax.block_until_ready(
        full_attention_new(qh, kh, vh, params["w_attn"], compute_dtype=jnp.float32,
                           l_block=8, force_streamed=True))
    assert jnp.allclose(v_st, v_ref, atol=2e-3, rtol=2e-3), "streamed path mismatch"

    print("KERNEL_OK")
</pallas_src>

<mosaic_0001>
module attributes {stable_mosaic.version = 11 : i64} {
  func.func @_attn_resident_kernel(%arg0: i32, %arg1: i32, %arg2: memref<1x16x32xf32, #tpu.memory_space<vmem>>, %arg3: memref<1x16x32xf32, #tpu.memory_space<vmem>>, %arg4: memref<1x16x32xf32, #tpu.memory_space<vmem>>, %arg5: memref<16x32xf32, #tpu.memory_space<vmem>>, %arg6: memref<1x16x32xf32, #tpu.memory_space<vmem>>) attributes {dimension_semantics = [#tpu.dimension_semantics<parallel>, #tpu.dimension_semantics<parallel>], iteration_bounds = array<i64: 2, 1>, scalar_prefetch = 0 : i64, scratch_operands = 0 : i64, tpu.core_type = #tpu.core_type<tc>, window_params = [{transform_indices = @transform_0, window_bounds = array<i64: 1, 16, 32>}, {transform_indices = @transform_1, window_bounds = array<i64: 1, 16, 32>}, {transform_indices = @transform_2, window_bounds = array<i64: 1, 16, 32>}, {pipeline_mode = #tpu.pipeline_mode<synchronous>, transform_indices = @transform_3, window_bounds = array<i64: 16, 32>}, {transform_indices = @transform_4, window_bounds = array<i64: 1, 16, 32>}]} {
    %c0 = arith.constant 0 : index
    %c0_0 = arith.constant 0 : index
    %c0_1 = arith.constant 0 : index
    %0 = vector.load %arg2[%c0, %c0_0, %c0_1] : memref<1x16x32xf32, #tpu.memory_space<vmem>>, vector<1x16x32xf32>
    %1 = vector.shape_cast %0 : vector<1x16x32xf32> to vector<16x32xf32>
    %c16_i32 = arith.constant 16 : i32
    %2 = arith.muli %arg1, %c16_i32 : i32
    %3 = tpu.assume_multiple %2, 16 : i32
    %c0_2 = arith.constant 0 : index
    %4 = arith.index_cast %3 : i32 to index
    %c0_3 = arith.constant 0 : index
    %5 = vector.load %arg3[%c0_2, %4, %c0_3] : memref<1x16x32xf32, #tpu.memory_space<vmem>>, vector<1x16x32xf32>
    %6 = vector.shape_cast %5 : vector<1x16x32xf32> to vector<16x32xf32>
    %c0_4 = arith.constant 0 : index
    %c0_5 = arith.constant 0 : index
    %c0_6 = arith.constant 0 : index
    %7 = vector.load %arg3[%c0_4, %c0_5, %c0_6] : memref<1x16x32xf32, #tpu.memory_space<vmem>>, vector<1x16x32xf32>
    %8 = vector.shape_cast %7 : vector<1x16x32xf32> to vector<16x32xf32>
    %c0_7 = arith.constant 0 : index
    %c0_8 = arith.constant 0 : index
    %c0_9 = arith.constant 0 : index
    %9 = vector.load %arg4[%c0_7, %c0_8, %c0_9] : memref<1x16x32xf32, #tpu.memory_space<vmem>>, vector<1x16x32xf32>
    %10 = vector.shape_cast %9 : vector<1x16x32xf32> to vector<16x32xf32>
    %c0_10 = arith.constant 0 : index
    %c0_11 = arith.constant 0 : index
    %11 = vector.load %arg5[%c0_10, %c0_11] : memref<16x32xf32, #tpu.memory_space<vmem>>, vector<16x32xf32>
    %12 = vector.extract_strided_slice %1 {offsets = [0, 0], sizes = [16, 8], strides = [1, 1]} : vector<16x32xf32> to vector<16x8xf32>
    %cst = arith.constant 0.353553385 : f32
    %13 = vector.broadcast %cst : f32 to vector<16x8xf32>
    %14 = arith.mulf %12, %13 : vector<16x8xf32>
    %15 = math.absf %12 : vector<16x8xf32>
    %16 = vector.extract_strided_slice %6 {offsets = [0, 0], sizes = [16, 8], strides = [1, 1]} : vector<16x32xf32> to vector<16x8xf32>
    %17 = math.absf %16 : vector<16x8xf32>
    %18 = arith.addf %15, %17 : vector<16x8xf32>
    %cst_12 = arith.constant 0.353553385 : f32
    %19 = vector.broadcast %cst_12 : f32 to vector<16x8xf32>
    %20 = arith.mulf %18, %19 : vector<16x8xf32>
    %21 = vector.extract_strided_slice %8 {offsets = [0, 0], sizes = [16, 8], strides = [1, 1]} : vector<16x32xf32> to vector<16x8xf32>
    %22 = vector.extract_strided_slice %11 {offsets = [0, 0], sizes = [16, 8], strides = [1, 1]} : vector<16x32xf32> to vector<16x8xf32>
    %cst_13 = arith.constant dense<0.000000e+00> : vector<16x16xf32>
    %23 = tpu.matmul %14, %21, %cst_13 {dimension_numbers = #tpu.dot_dimension_numbers<[1], [1], [0], [0], [0, 0, 1, 0], [], []>} : vector<16x8xf32>, vector<16x8xf32>, vector<16x16xf32> -> vector<16x16xf32>
    %24 = arith.truncf %23 : vector<16x16xf32> to vector<16x16xbf16>
    %cst_14 = arith.constant dense<0.000000e+00> : vector<16x16xf32>
    %25 = tpu.matmul %20, %22, %cst_14 {dimension_numbers = #tpu.dot_dimension_numbers<[1], [1], [0], [0], [0, 0, 1, 0], [], []>} : vector<16x8xf32>, vector<16x8xf32>, vector<16x16xf32> -> vector<16x16xf32>
    %26 = arith.truncf %25 : vector<16x16xf32> to vector<16x16xbf16>
    %27 = math.tanh %24 : vector<16x16xbf16>
    %28 = arith.negf %26 : vector<16x16xbf16>
    %29 = math.exp %28 : vector<16x16xbf16>
    %cst_15 = arith.constant 1.000000e+00 : bf16
    %30 = vector.broadcast %cst_15 : bf16 to vector<16x16xbf16>
    %31 = arith.addf %30, %29 : vector<16x16xbf16>
    %32 = arith.divf %30, %31 : vector<16x16xbf16>
    %33 = arith.mulf %27, %32 : vector<16x16xbf16>
    %34 = math.exp %33 : vector<16x16xbf16>
    %35 = arith.extf %34 : vector<16x16xbf16> to vector<16x16xf32>
    %cst_16 = arith.constant dense<0.000000e+00> : vector<16xf32>
    %36 = vector.multi_reduction <add>, %35, %cst_16 [1] : vector<16x16xf32> to vector<16xf32>
    %37 = vector.shape_cast %36 : vector<16xf32> to vector<16x1xf32>
    %38 = vector.extract_strided_slice %10 {offsets = [0, 0], sizes = [16, 8], strides = [1, 1]} : vector<16x32xf32> to vector<16x8xf32>
    %39 = arith.truncf %38 : vector<16x8xf32> to vector<16x8xbf16>
    %cst_17 = arith.constant dense<0.000000e+00> : vector<16x8xf32>
    %40 = tpu.matmul %34, %39, %cst_17 {dimension_numbers = #tpu.dot_dimension_numbers<[1], [0], [0], [1], [0, 0, 1, 1], [], []>} : vector<16x16xbf16>, vector<16x8xbf16>, vector<16x8xf32> -> vector<16x8xf32>
    %41 = tpu.reciprocal %37 {approx = true} : vector<16x1xf32> -> vector<16x1xf32>
    %42 = vector.broadcast %41 : vector<16x1xf32> to vector<16x8xf32>
    %43 = arith.mulf %40, %42 : vector<16x8xf32>
    %44 = vector.extract_strided_slice %1 {offsets = [0, 8], sizes = [16, 8], strides = [1, 1]} : vector<16x32xf32> to vector<16x8xf32>
    %cst_18 = arith.constant 0.353553385 : f32
    %45 = vector.broadcast %cst_18 : f32 to vector<16x8xf32>
    %46 = arith.mulf %44, %45 : vector<16x8xf32>
    %47 = math.absf %44 : vector<16x8xf32>
    %48 = vector.extract_strided_slice %6 {offsets = [0, 8], sizes = [16, 8], strides = [1, 1]} : vector<16x32xf32> to vector<16x8xf32>
    %49 = math.absf %48 : vector<16x8xf32>
    %50 = arith.addf %47, %49 : vector<16x8xf32>
    %cst_19 = arith.constant 0.353553385 : f32
    %51 = vector.broadcast %cst_19 : f32 to vector<16x8xf32>
    %52 = arith.mulf %50, %51 : vector<16x8xf32>
    %53 = vector.extract_strided_slice %8 {offsets = [0, 8], sizes = [16, 8], strides = [1, 1]} : vector<16x32xf32> to vector<16x8xf32>
    %54 = vector.extract_strided_slice %11 {offsets = [0, 8], sizes = [16, 8], strides = [1, 1]} : vector<16x32xf32> to vector<16x8xf32>
    %cst_20 = arith.constant dense<0.000000e+00> : vector<16x16xf32>
    %55 = tpu.matmul %46, %53, %cst_20 {dimension_numbers = #tpu.dot_dimension_numbers<[1], [1], [0], [0], [0, 0, 1, 0], [], []>} : vector<16x8xf32>, vector<16x8xf32>, vector<16x16xf32> -> vector<16x16xf32>
    %56 = arith.truncf %55 : vector<16x16xf32> to vector<16x16xbf16>
    %cst_21 = arith.constant dense<0.000000e+00> : vector<16x16xf32>
    %57 = tpu.matmul %52, %54, %cst_21 {dimension_numbers = #tpu.dot_dimension_numbers<[1], [1], [0], [0], [0, 0, 1, 0], [], []>} : vector<16x8xf32>, vector<16x8xf32>, vector<16x16xf32> -> vector<16x16xf32>
    %58 = arith.truncf %57 : vector<16x16xf32> to vector<16x16xbf16>
    %59 = math.tanh %56 : vector<16x16xbf16>
    %60 = arith.negf %58 : vector<16x16xbf16>
    %61 = math.exp %60 : vector<16x16xbf16>
    %cst_22 = arith.constant 1.000000e+00 : bf16
    %62 = vector.broadcast %cst_22 : bf16 to vector<16x16xbf16>
    %63 = arith.addf %62, %61 : vector<16x16xbf16>
    %64 = arith.divf %62, %63 : vector<16x16xbf16>
    %65 = arith.mulf %59, %64 : vector<16x16xbf16>
    %66 = math.exp %65 : vector<16x16xbf16>
    %67 = arith.extf %66 : vector<16x16xbf16> to vector<16x16xf32>
    %cst_23 = arith.constant dense<0.000000e+00> : vector<16xf32>
    %68 = vector.multi_reduction <add>, %67, %cst_23 [1] : vector<16x16xf32> to vector<16xf32>
    %69 = vector.shape_cast %68 : vector<16xf32> to vector<16x1xf32>
    %70 = vector.extract_strided_slice %10 {offsets = [0, 8], sizes = [16, 8], strides = [1, 1]} : vector<16x32xf32> to vector<16x8xf32>
    %71 = arith.truncf %70 : vector<16x8xf32> to vector<16x8xbf16>
    %cst_24 = arith.constant dense<0.000000e+00> : vector<16x8xf32>
    %72 = tpu.matmul %66, %71, %cst_24 {dimension_numbers = #tpu.dot_dimension_numbers<[1], [0], [0], [1], [0, 0, 1, 1], [], []>} : vector<16x16xbf16>, vector<16x8xbf16>, vector<16x8xf32> -> vector<16x8xf32>
    %73 = tpu.reciprocal %69 {approx = true} : vector<16x1xf32> -> vector<16x1xf32>
    %74 = vector.broadcast %73 : vector<16x1xf32> to vector<16x8xf32>
    %75 = arith.mulf %72, %74 : vector<16x8xf32>
    %76 = vector.extract_strided_slice %1 {offsets = [0, 16], sizes = [16, 8], strides = [1, 1]} : vector<16x32xf32> to vector<16x8xf32>
    %cst_25 = arith.constant 0.353553385 : f32
    %77 = vector.broadcast %cst_25 : f32 to vector<16x8xf32>
    %78 = arith.mulf %76, %77 : vector<16x8xf32>
    %79 = math.absf %76 : vector<16x8xf32>
    %80 = vector.extract_strided_slice %6 {offsets = [0, 16], sizes = [16, 8], strides = [1, 1]} : vector<16x32xf32> to vector<16x8xf32>
    %81 = math.absf %80 : vector<16x8xf32>
    %82 = arith.addf %79, %81 : vector<16x8xf32>
    %cst_26 = arith.constant 0.353553385 : f32
    %83 = vector.broadcast %cst_26 : f32 to vector<16x8xf32>
    %84 = arith.mulf %82, %83 : vector<16x8xf32>
    %85 = vector.extract_strided_slice %8 {offsets = [0, 16], sizes = [16, 8], strides = [1, 1]} : vector<16x32xf32> to vector<16x8xf32>
    %86 = vector.extract_strided_slice %11 {offsets = [0, 16], sizes = [16, 8], strides = [1, 1]} : vector<16x32xf32> to vector<16x8xf32>
    %cst_27 = arith.constant dense<0.000000e+00> : vector<16x16xf32>
    %87 = tpu.matmul %78, %85, %cst_27 {dimension_numbers = #tpu.dot_dimension_numbers<[1], [1], [0], [0], [0, 0, 1, 0], [], []>} : vector<16x8xf32>, vector<16x8xf32>, vector<16x16xf32> -> vector<16x16xf32>
    %88 = arith.truncf %87 : vector<16x16xf32> to vector<16x16xbf16>
    %cst_28 = arith.constant dense<0.000000e+00> : vector<16x16xf32>
    %89 = tpu.matmul %84, %86, %cst_28 {dimension_numbers = #tpu.dot_dimension_numbers<[1], [1], [0], [0], [0, 0, 1, 0], [], []>} : vector<16x8xf32>, vector<16x8xf32>, vector<16x16xf32> -> vector<16x16xf32>
    %90 = arith.truncf %89 : vector<16x16xf32> to vector<16x16xbf16>
    %91 = math.tanh %88 : vector<16x16xbf16>
    %92 = arith.negf %90 : vector<16x16xbf16>
    %93 = math.exp %92 : vector<16x16xbf16>
    %cst_29 = arith.constant 1.000000e+00 : bf16
    %94 = vector.broadcast %cst_29 : bf16 to vector<16x16xbf16>
    %95 = arith.addf %94, %93 : vector<16x16xbf16>
    %96 = arith.divf %94, %95 : vector<16x16xbf16>
    %97 = arith.mulf %91, %96 : vector<16x16xbf16>
    %98 = math.exp %97 : vector<16x16xbf16>
    %99 = arith.extf %98 : vector<16x16xbf16> to vector<16x16xf32>
    %cst_30 = arith.constant dense<0.000000e+00> : vector<16xf32>
    %100 = vector.multi_reduction <add>, %99, %cst_30 [1] : vector<16x16xf32> to vector<16xf32>
    %101 = vector.shape_cast %100 : vector<16xf32> to vector<16x1xf32>
    %102 = vector.extract_strided_slice %10 {offsets = [0, 16], sizes = [16, 8], strides = [1, 1]} : vector<16x32xf32> to vector<16x8xf32>
    %103 = arith.truncf %102 : vector<16x8xf32> to vector<16x8xbf16>
    %cst_31 = arith.constant dense<0.000000e+00> : vector<16x8xf32>
    %104 = tpu.matmul %98, %103, %cst_31 {dimension_numbers = #tpu.dot_dimension_numbers<[1], [0], [0], [1], [0, 0, 1, 1], [], []>} : vector<16x16xbf16>, vector<16x8xbf16>, vector<16x8xf32> -> vector<16x8xf32>
    %105 = tpu.reciprocal %101 {approx = true} : vector<16x1xf32> -> vector<16x1xf32>
    %106 = vector.broadcast %105 : vector<16x1xf32> to vector<16x8xf32>
    %107 = arith.mulf %104, %106 : vector<16x8xf32>
    %108 = vector.extract_strided_slice %1 {offsets = [0, 24], sizes = [16, 8], strides = [1, 1]} : vector<16x32xf32> to vector<16x8xf32>
    %cst_32 = arith.constant 0.353553385 : f32
    %109 = vector.broadcast %cst_32 : f32 to vector<16x8xf32>
    %110 = arith.mulf %108, %109 : vector<16x8xf32>
    %111 = math.absf %108 : vector<16x8xf32>
    %112 = vector.extract_strided_slice %6 {offsets = [0, 24], sizes = [16, 8], strides = [1, 1]} : vector<16x32xf32> to vector<16x8xf32>
    %113 = math.absf %112 : vector<16x8xf32>
    %114 = arith.addf %111, %113 : vector<16x8xf32>
    %cst_33 = arith.constant 0.353553385 : f32
    %115 = vector.broadcast %cst_33 : f32 to vector<16x8xf32>
    %116 = arith.mulf %114, %115 : vector<16x8xf32>
    %117 = vector.extract_strided_slice %8 {offsets = [0, 24], sizes = [16, 8], strides = [1, 1]} : vector<16x32xf32> to vector<16x8xf32>
    %118 = vector.extract_strided_slice %11 {offsets = [0, 24], sizes = [16, 8], strides = [1, 1]} : vector<16x32xf32> to vector<16x8xf32>
    %cst_34 = arith.constant dense<0.000000e+00> : vector<16x16xf32>
    %119 = tpu.matmul %110, %117, %cst_34 {dimension_numbers = #tpu.dot_dimension_numbers<[1], [1], [0], [0], [0, 0, 1, 0], [], []>} : vector<16x8xf32>, vector<16x8xf32>, vector<16x16xf32> -> vector<16x16xf32>
    %120 = arith.truncf %119 : vector<16x16xf32> to vector<16x16xbf16>
    %cst_35 = arith.constant dense<0.000000e+00> : vector<16x16xf32>
    %121 = tpu.matmul %116, %118, %cst_35 {dimension_numbers = #tpu.dot_dimension_numbers<[1], [1], [0], [0], [0, 0, 1, 0], [], []>} : vector<16x8xf32>, vector<16x8xf32>, vector<16x16xf32> -> vector<16x16xf32>
    %122 = arith.truncf %121 : vector<16x16xf32> to vector<16x16xbf16>
    %123 = math.tanh %120 : vector<16x16xbf16>
    %124 = arith.negf %122 : vector<16x16xbf16>
    %125 = math.exp %124 : vector<16x16xbf16>
    %cst_36 = arith.constant 1.000000e+00 : bf16
    %126 = vector.broadcast %cst_36 : bf16 to vector<16x16xbf16>
    %127 = arith.addf %126, %125 : vector<16x16xbf16>
    %128 = arith.divf %126, %127 : vector<16x16xbf16>
    %129 = arith.mulf %123, %128 : vector<16x16xbf16>
    %130 = math.exp %129 : vector<16x16xbf16>
    %131 = arith.extf %130 : vector<16x16xbf16> to vector<16x16xf32>
    %cst_37 = arith.constant dense<0.000000e+00> : vector<16xf32>
    %132 = vector.multi_reduction <add>, %131, %cst_37 [1] : vector<16x16xf32> to vector<16xf32>
    %133 = vector.shape_cast %132 : vector<16xf32> to vector<16x1xf32>
    %134 = vector.extract_strided_slice %10 {offsets = [0, 24], sizes = [16, 8], strides = [1, 1]} : vector<16x32xf32> to vector<16x8xf32>
    %135 = arith.truncf %134 : vector<16x8xf32> to vector<16x8xbf16>
    %cst_38 = arith.constant dense<0.000000e+00> : vector<16x8xf32>
    %136 = tpu.matmul %130, %135, %cst_38 {dimension_numbers = #tpu.dot_dimension_numbers<[1], [0], [0], [1], [0, 0, 1, 1], [], []>} : vector<16x16xbf16>, vector<16x8xbf16>, vector<16x8xf32> -> vector<16x8xf32>
    %137 = tpu.reciprocal %133 {approx = true} : vector<16x1xf32> -> vector<16x1xf32>
    %138 = vector.broadcast %137 : vector<16x1xf32> to vector<16x8xf32>
    %139 = arith.mulf %136, %138 : vector<16x8xf32>
    %140 = tpu.concatenate %43, %75, %107, %139 in 1 : vector<16x8xf32>, vector<16x8xf32>, vector<16x8xf32>, vector<16x8xf32> -> vector<16x32xf32>
    %c0_39 = arith.constant 0 : index
    %c0_40 = arith.constant 0 : index
    %c0_41 = arith.constant 0 : index
    %141 = vector.load %arg6[%c0_39, %c0_40, %c0_41] : memref<1x16x32xf32, #tpu.memory_space<vmem>>, vector<1x16x32xf32>
    %142 = vector.shape_cast %141 : vector<1x16x32xf32> to vector<16x32xf32>
    %143 = vector.shape_cast %140 : vector<16x32xf32> to vector<1x16x32xf32>
    tpu.vector_store %arg6[%c0_39, %c0_40, %c0_41], %143 {strides = array<i32>} : memref<1x16x32xf32, #tpu.memory_space<vmem>>, vector<1x16x32xf32>,
    return
  }
  func.func @transform_0(%arg0: i32, %arg1: i32) -> (i32, i32, i32) {
    %c0_i32 = arith.constant 0 : i32
    %c0_i32_0 = arith.constant 0 : i32
    return %arg0, %arg1, %c0_i32 : i32, i32, i32
  }
  func.func @transform_1(%arg0: i32, %arg1: i32) -> (i32, i32, i32) {
    %c0_i32 = arith.constant 0 : i32
    %c0_i32_0 = arith.constant 0 : i32
    %c0_i32_1 = arith.constant 0 : i32
    return %arg0, %c0_i32, %c0_i32_0 : i32, i32, i32
  }
  func.func @transform_2(%arg0: i32, %arg1: i32) -> (i32, i32, i32) {
    %c0_i32 = arith.constant 0 : i32
    %c0_i32_0 = arith.constant 0 : i32
    %c0_i32_1 = arith.constant 0 : i32
    return %arg0, %c0_i32, %c0_i32_0 : i32, i32, i32
  }
  func.func @transform_3(%arg0: i32, %arg1: i32) -> (i32, i32) {
    %c0_i32 = arith.constant 0 : i32
    %c0_i32_0 = arith.constant 0 : i32
    %c0_i32_1 = arith.constant 0 : i32
    return %c0_i32, %c0_i32_0 : i32, i32
  }
  func.func @transform_4(%arg0: i32, %arg1: i32) -> (i32, i32, i32) {
    %c0_i32 = arith.constant 0 : i32
    %c0_i32_0 = arith.constant 0 : i32
    return %arg0, %arg1, %c0_i32 : i32, i32, i32
  }
}

</mosaic_0001>

<bundles_post_ra>
// kernel: tpu_custom_call.1
= control target key start
LH: loop header
LB: loop body
LE: loop exit
PB: predicated region body
PF: predicated region fallthrough
CT: control target
= control target key end

     0   :  { %s2694_s0 = inlined_call_operand.hbm [shape: f32[2,16,32], index: 0, kind: input, shape index: {}]   ;;  %s2695_s1 = inlined_call_operand.hbm [shape: f32[2,16,32], index: 1, kind: input, shape index: {}]   ;;  %s2696_s2 = inlined_call_operand.hbm [shape: f32[2,16,32], index: 2, kind: input, shape index: {}]   ;;  %s2697_s3 = inlined_call_operand.hbm [shape: f32[16,32], index: 3, kind: input, shape index: {}]   ;;  %s2698_s4 = inlined_call_operand.hbm [shape: f32[2,16,32], index: 4, kind: output, shape index: {}]  }
   0x1   :  { %2716 = sst [smem:[#allocation19_spill]] %s2694_s0 }
   0x2   :  { %2717 = sst [smem:[#allocation20_spill]] %s2695_s1 }
   0x3   :  { %9 = vsyncpa [#allocation3], 0 }
   0x4   :  { %11 = vsyncpa [#allocation3 + $0x1], 0 }
   0x5   :  { %12 = vsyncpa [#allocation6], 0 }
   0x6   :  { %14 = vsyncpa [#allocation6 + $0x1], 0 }
   0x7   :  { %15 = vsyncpa [#allocation9], 0 }
   0x8   :  { %16 = vsyncpa [#allocation4], 0 }
   0x9   :  { %18 = vsyncpa [#allocation4 + $0x1], 0  ;;  %s2217_s15 = smov 0   ;;  %s2219_s16 = smov 0  }
   0xa   :  { %s2221_s17 = smov 0   ;;  %s2223_s18 = smov 0  }
   0xb   :  { %s2225_s19 = smov 0   ;;  %s2227_s20 = smov 0  }
   0xc LB: > { %2718 = sst [smem:[#allocation15_spill]] %s2162_s17  ;;  %s36_s21 = sadd.s32 1, %s2170_s19  ;;  %s2174_s20 = sphi %s2227_s20, %s24_s20   ;;  %s2170_s19 = sphi %s2225_s19, %s2750_s19   ;;  %s2166_s18 = sphi %s2223_s18, %s2749_s18   ;;  %s2162_s17 = sphi %s2221_s17, %s2748_s17   ;;  %s2158_s16 = sphi %s2219_s16, %s2752_s16   ;;  %s2154_s15 = sphi %s2217_s15, %s2751_s15  }
   0xd   : > { %2719 = sst [smem:[#allocation16_spill]] %s2170_s19  ;;  %s45_s22 = sadd.s32 1, %s2162_s17 }
   0xe   : > { %p38_p0 = scmp.ge.s32.totalorder %s36_s21, 2  ;;  %p2699_p1 = scmp.ne.s32.totalorder %s2162_s17, %s2158_s16 }
   0xf   : > { %p53_p2 = scmp.eq.s32.totalorder %s2174_s20, 0  ;;  %p1825_p6 = scmp.lt.s32.totalorder %s2174_s20, 2 }
  0x10   : > { %s2754_s21 = smov (%p38_p0, %s36_s21), 0  ;;  %s2704_s24 = sand.u32 1, %s2162_s17  }
  0x11   : > { %2720 = sst [smem:[#allocation17_spill]] %s2754_s21  ;;  %p54_p3 = por %p53_p2, %p2699_p1 }
  0x12   : > { %s40_s23 = ssub.s32 %s2170_s19, %s2754_s21  ;;  %s2263_s25 = sshll.u32 %s2170_s19, 8 }
  0x13   : > { %p43_p5 = scmp.eq.s32.totalorder %s40_s23, 0  ;;  %s2270_s27 = sshll.u32 %s2704_s24, 4 }
  0x14   : > { %p2272_p7 = pnand %p1825_p6, %p54_p3  ;;  %s219_s29 = sand.u32 1, %s2174_s20  }
  0x15   : > { %s2266_s26 = scalar_select %p43_p5, %s2162_s17, %s45_s22  }
  0x16   : > { %s2722_s28 = scalar_select %p2272_p7, 1, 0 }
  0x17   : > { %2721 = sst [smem:[#allocation18_spill]] %s2266_s26  ;;  %s2723_s1 = sld [smem:[#allocation20_spill]] }
  0x18   : > { %s223_s7 = scalar_lea.vmem [#allocation5], %s2270_s27  ;;  %s2286_s9 = scalar_lea.sflag [#allocation6], %s219_s29 }
  0x19   : > { %s230_s8 = sshll.u32 %s223_s7, 4  ;;  %p2292_p9 = pneg %p2272_p7  ;;  %s2284_s8 = int_to_ptr.vmem [resolvable:$true] %s230_s8 }
  0x1b   : > { %s2724_s11 = scalar_select %p2292_p9, 1, 0 }
  0x1d   : > { %s2281_s6 = scalar_lea.hbm %s2723_s1, %s2263_s25  ;;  %s1971_s14 = scalar_lea.hbm %s2723_s1, 512 }
  0x1e   : > { %s1966_s10 = scalar_lea.hbm %s2281_s6, 256  ;;  %p1972_p12 = scmp.lt.u32.totalorder %s2281_s6, %s2723_s1 }
  0x1f   : > { %p1967_p8 = scmp.ne.s32.totalorder %s2281_s6, %s1966_s10  ;;  %p1973_p13 = scmp.lt.u32.totalorder %s1971_s14, %s1966_s10 }
  0x20   : > { %p1975_p2 = scmp.lt.u32.totalorder %s1966_s10, %s2281_s6 }
  0x21   : > { %p1969_p10 = pnand %p2292_p9, %p1967_p8  ;;  %p1974_p0 = por %p1973_p13, %p1972_p12 }
  0x23   : > { %p1970_p11 = pneg %p1969_p10  ;;  %p1976_p3 = por %p1975_p2, %p1974_p0 }
  0x25   : > { %p1977_p5 = pnand %p1976_p3, %p1970_p11 }
  0x27   : > { %1980 = shalt.err (!%p1977_p5)
}
  0x28   : > { %s1981_s29 = scalar_lea.vmem %s2284_s8, 256  ;;  %s2176_s30 = smov [#allocation5]  }
  0x29   : > { %p1982_p6 = scmp.ne.s32.totalorder %s2284_s8, %s1981_s29  ;;  %s1986_s5 = sshll.u32 %s2176_s30, 4  ;;  %s1987_s5 = int_to_ptr.vmem [resolvable:$false] %s1986_s5 }
  0x2a   : > { %s1988_s7 = scalar_lea.vmem %s1987_s5, 512  ;;  %p1989_p4 = scmp.lt.s32.totalorder %s2284_s8, %s1987_s5 }
  0x2b   : > { %p1984_p8 = pnand %p1982_p6, %p2292_p9  ;;  %p1990_p1 = scmp.lt.s32.totalorder %s1988_s7, %s1981_s29 }
  0x2d   : > { %p1985_p10 = pneg %p1984_p8  ;;  %p1991_p12 = por %p1990_p1, %p1989_p4 }
  0x2f   : > { %p1992_p13 = pnand %p1991_p12, %p1985_p10 }
  0x31   : > { %1995 = shalt.err (!%p1992_p13)
}
  0x32   : > { %s2700_s10 = smov 128   ;;  %s2702_s12 = smov 8  }
  0x33   : > { %1816 = dma.hbm_to_vmem [thread:$0]  (!%p2272_p7), %s2281_s6, 256, %s2284_s8, %s2286_s9, %s2700_s10, %s2700_s10, %s2702_s12  }
  0x34   : > { %s2320_s13 = sadd.s32 4294967295, %s2174_s20   ;;  %s1558_s14 = sadd.s32 4294967294, %s2174_s20  }
  0x35   : > { %p58_p1 = scmp.ne.s32.totalorder %s2158_s16, %s2154_s15  ;;  %p2707_p4 = scmp.eq.s32.totalorder %s2320_s13, 0 }
  0x36   : > { %p157_p11 = scmp.eq.s32.totalorder %s2320_s13, 1  ;;  %p163_p0 = scmp.eq.s32.totalorder %s1558_s14, 1 }
  0x37   : > { %p1559_p2 = scmp.ge.s32.totalorder %s2174_s20, 1  ;;  %p2330_p3 = por %p2707_p4, %p58_p1 }
  0x38   : > { %p2726_p5 = scmp.ne.s32.totalorder %s2162_s17, %s2158_s16  ;;  %p2341_p8 = por %p163_p0, %p58_p1 }
  0x39   : > { %s2725_s22 = scalar_select %p2330_p3, 1, 0 }
  0x3a   : > { %p2337_p6 = por %p157_p11, %p2726_p5  ;;  %p170_p10 = scmp.lt.s32.totalorder %s2174_s20, 3 }
  0x3b   : > { %s2728_s8 = scalar_select %p2341_p8, 1, 0 }
  0x3c   : > { %s2727_s6 = scalar_select %p2337_p6, 1, 0 }
  0x3d   : > { %p2346_p12 = pnand %p1559_p2, %p170_p10  ;;  %s2179_s29 = smov [#allocation8]  }
  0x3e   : > { %s182_s30 = sshll.u32 %s2179_s29, 4  ;;  %s2730_s0 = sld [smem:[#allocation19_spill]]  ;;  %s2350_s30 = int_to_ptr.vmem [resolvable:$true] %s182_s30 }
  0x3f   : > { %s2729_s23 = scalar_select %p2346_p12, 1, 0 }
  0x40   : > { %p1806_p13 = pneg %p2346_p12  ;;  %s200_s10 = scalar_lea.vmem [#allocation2], %s2270_s27 }
  0x41   : > { %s209_s12 = sshll.u32 %s200_s10, 4  ;;  %s2732_s29 = sand.u32 1, %s2162_s17   ;;  %s2367_s12 = int_to_ptr.vmem [resolvable:$true] %s209_s12 }
  0x42   : > { %p2363_p1 = pnand %p1806_p13, %p2707_p4  ;;  %s2371_s1 = scalar_lea.sflag [#allocation3], %s2732_s29 }
  0x44   : > { %s2358_s14 = scalar_lea.hbm %s2730_s0, %s2263_s25  ;;  %s2001_s19 = scalar_lea.hbm %s2730_s0, 512 }
  0x45   : > { %s2731_s24 = scalar_select %p2363_p1, 1, 0 }
  0x46   : > { %s1996_s21 = scalar_lea.hbm %s2358_s14, 256  ;;  %p2002_p5 = scmp.lt.u32.totalorder %s2358_s14, %s2730_s0 }
  0x47   : > { %p1997_p11 = scmp.ne.s32.totalorder %s2358_s14, %s1996_s21  ;;  %p2003_p10 = scmp.lt.u32.totalorder %s2001_s19, %s1996_s21 }
  0x48   : > { %p2005_p4 = scmp.lt.u32.totalorder %s1996_s21, %s2358_s14 }
  0x49   : > { %p1999_p0 = pnand %p1997_p11, %p2292_p9  ;;  %p2004_p13 = por %p2003_p10, %p2002_p5 }
  0x4b   : > { %p2000_p2 = pneg %p1999_p0  ;;  %p2006_p8 = por %p2005_p4, %p2004_p13 }
  0x4d   : > { %p2007_p6 = pnand %p2006_p8, %p2000_p2 }
  0x4f   : > { %2010 = shalt.err (!%p2007_p6)
}
  0x50   : > { %s2011_s29 = scalar_lea.vmem %s2367_s12, 256  ;;  %s2180_s5 = smov [#allocation2]  }
  0x51   : > { %p2012_p11 = scmp.ne.s32.totalorder %s2367_s12, %s2011_s29  ;;  %s2016_s7 = sshll.u32 %s2180_s5, 4  ;;  %s2017_s7 = int_to_ptr.vmem [resolvable:$false] %s2016_s7 }
  0x52   : > { %s2018_s26 = scalar_lea.vmem %s2017_s7, 512  ;;  %p2019_p12 = scmp.lt.s32.totalorder %s2367_s12, %s2017_s7 }
  0x53   : > { %p2014_p0 = pnand %p2012_p11, %p2292_p9  ;;  %p2020_p1 = scmp.lt.s32.totalorder %s2018_s26, %s2011_s29 }
  0x55   : > { %p2015_p3 = pneg %p2014_p0  ;;  %p2021_p5 = por %p2020_p1, %p2019_p12 }
  0x57   : > { %p2022_p10 = pnand %p2021_p5, %p2015_p3 }
  0x59   : > { %2025 = shalt.err (!%p2022_p10)
}
  0x5a   : > { %s2733_s19 = smov 8   ;;  %s2734_s21 = smov 128  }
  0x5b   : > { %1813 = dma.hbm_to_vmem [thread:$0]  (!%p2272_p7), %s2358_s14, 256, %s2367_s12, %s2371_s1, %s2734_s21, %s2734_s21, %s2733_s19  }
  0x5c   : > { %s2026_s5 = scalar_lea.hbm %s2697_s3, 256  ;;  %p2735_p3 = scmp.ne.s32.totalorder %s2731_s24, 0 }
  0x5d   : > { %p2027_p4 = scmp.ne.s32.totalorder %s2697_s3, %s2026_s5  ;;  %p2033_p1 = scmp.lt.u32.totalorder %s2026_s5, %s2697_s3 }
  0x5e   : > { %p2028_p6 = pneg %p2735_p3 }
  0x60   : > { %p2029_p8 = pnand %p2028_p6, %p2027_p4 }
  0x62   : > { %p2030_p12 = pneg %p2029_p8 }
  0x64   : > { %p2035_p2 = pnand %p2033_p1, %p2030_p12 }
  0x66   : > { %2038 = shalt.err (!%p2035_p2)
}
  0x67   : > { %s2039_s1 = scalar_lea.vmem %s2350_s30, 256  ;;  %p2047_p5 = scmp.lt.s32.totalorder %s2350_s30, %s2350_s30 }
  0x68   : > { %p2040_p13 = scmp.ne.s32.totalorder %s2350_s30, %s2039_s1  ;;  %p2048_p10 = scmp.lt.s32.totalorder %s2039_s1, %s2039_s1 }
  0x6a   : > { %p2042_p11 = pnand %p2040_p13, %p2028_p6  ;;  %p2049_p7 = por %p2048_p10, %p2047_p5 }
  0x6c   : > { %p2043_p0 = pneg %p2042_p11 }
  0x6e   : > { %p2050_p9 = pnand %p2049_p7, %p2043_p0 }
  0x70   : > { %2053 = shalt.err (!%p2050_p9)
}
  0x71   : > { %1809 = dma.hbm_to_vmem [thread:$0]  (!%p2735_p3), %s2697_s3, 256, %s2350_s30, [#allocation9], %s2734_s21, %s2734_s21, %s2733_s19  }
  0x72   : > { %s2426_s10 = scalar_lea.hbm %s2696_s2, %s2263_s25  ;;  %s244_s24 = scalar_lea.vmem [#allocation7], %s2270_s27 }
  0x73   : > { %s251_s5 = sshll.u32 %s244_s24, 4  ;;  %s2054_s7 = scalar_lea.hbm %s2426_s10, 256  ;;  %s2429_s5 = int_to_ptr.vmem [resolvable:$true] %s251_s5 }
  0x74   : > { %p2055_p7 = scmp.ne.s32.totalorder %s2426_s10, %s2054_s7  ;;  %p2736_p9 = scmp.ne.s32.totalorder %s2724_s11, 0 }
  0x75   : > { %s2059_s26 = scalar_lea.hbm %s2696_s2, 512  ;;  %p2060_p3 = scmp.lt.u32.totalorder %s2426_s10, %s2696_s2 }
  0x76   : > { %p2057_p4 = pnand %p2055_p7, %p2736_p9  ;;  %p2061_p8 = scmp.lt.u32.totalorder %s2059_s26, %s2054_s7 }
  0x77   : > { %p2063_p1 = scmp.lt.u32.totalorder %s2054_s7, %s2426_s10 }
  0x78   : > { %p2058_p6 = pneg %p2057_p4  ;;  %p2062_p12 = por %p2061_p8, %p2060_p3 }
  0x7a   : > { %p2064_p2 = por %p2063_p1, %p2062_p12 }
  0x7c   : > { %p2065_p13 = pnand %p2064_p2, %p2058_p6 }
  0x7e   : > { %2068 = shalt.err (!%p2065_p13)
}
  0x7f   : > { %s2069_s27 = scalar_lea.vmem %s2429_s5, 256  ;;  %s2181_s0 = smov [#allocation7]  }
  0x80   : > { %p2070_p11 = scmp.ne.s32.totalorder %s2429_s5, %s2069_s27  ;;  %s2074_s17 = sshll.u32 %s2181_s0, 4  ;;  %s2075_s17 = int_to_ptr.vmem [resolvable:$false] %s2074_s17 }
  0x81   : > { %s2076_s12 = scalar_lea.vmem %s2075_s17, 512  ;;  %p2077_p10 = scmp.lt.s32.totalorder %s2429_s5, %s2075_s17 }
  0x82   : > { %p2072_p0 = pnand %p2070_p11, %p2736_p9  ;;  %p2078_p7 = scmp.lt.s32.totalorder %s2076_s12, %s2069_s27 }
  0x84   : > { %p2073_p5 = pneg %p2072_p0  ;;  %p2079_p4 = por %p2078_p7, %p2077_p10 }
  0x86   : > { %p2080_p3 = pnand %p2079_p4, %p2073_p5 }
  0x88   : > { %2083 = shalt.err (!%p2080_p3)
}
  0x89   : > { %p2737_p6 = scmp.ne.s32.totalorder %s2722_s28, 0  ;;  %p2738_p9 = scmp.ne.s32.totalorder %s2729_s23, 0 }
  0x8a   : > { %s2459_s11 = sand.u32 (!%p2738_p9), 1, %s2158_s16   ;;  %p2739_p8 = scmp.ne.s32.totalorder (!%p2738_p9), %s2725_s22, 0 }
  0x8b   : > { %1819 = dma.hbm_to_vmem [thread:$0]  (!%p2737_p6), %s2426_s10, 256, %s2429_s5, %s2286_s9, %s2734_s21, %s2734_s21, %s2733_s19  }
  0x8c   : > { %263 = sbr.rel (%p2738_p9) target bundleno = 1580 (0x62c), region = 36  ;;  %s2462_s14 = sshll.u32 (!%p2738_p9), %s2459_s11, 4 }
  0x8d   : > { %s266_s28 = scalar_lea.sflag (!%p2738_p9), [#allocation3], %s2459_s11  ;;  %s269_s24 = scalar_lea.vmem (!%p2738_p9), [#allocation2], %s2462_s14 }
  0x93   : > { %2137 = dma.done.wait (%p2739_p8), %s266_s28, 256  }
  0x94   : > { %2139 = vsyncadd (%p2739_p8), %s266_s28, 4294967040  ;;  %s274_s9 = sand.u32 1, %s2320_s13   ;;  %s278_s19 = scalar_lea.vmem [#allocation5], %s2462_s14 }
  0x95   : > { %s275_s23 = scalar_lea.sflag [#allocation6], %s274_s9 }
  0x96   : > { %2141 = dma.done.wait (%p2739_p8), %s275_s23, 512  }
  0x97   : > { %2143 = vsyncadd (%p2739_p8), %s275_s23, 4294966784  ;;  %s287_s21 = scalar_lea.vmem [#allocation7], %s2462_s14  ;;  %p2740_p12 = scmp.eq.s32.totalorder %s2320_s13, 0 }
  0x99   : > { %2145 = dma.done.wait (%p2740_p12), [#allocation9], 256   ;;  %p2741_p1 = pmov %p2740_p12 }
  0x9a   : > { %vm352_vm0 = vcmask 64512   ;;  %v340_v1 = vld [vmem:[#allocation8] sm:$0xff]  ;;  %v341_v2 = vld [vmem:[#allocation8 + $0x8] sm:$0xff]  ;;  %s2182_s13 = smov 120   ;;  %v2183_v24 = vmov 0.0   ;;  %vm2184_vm2 = vmmov 0  }
  0x9b   : > { %2147 = vsyncadd (%p2741_p1), [#allocation9], 4294967040  ;;  %v330_v3 = vld [vmem:[%s269_s24] sm:$0xff]  ;;  %v1752_v4 = vpack.c.bf16 %v341_v2, %v340_v1  ;;  %v331_v7 = vld [vmem:[%s269_s24 + $0x8] sm:$0xff]  ;;  %v2487_v9 = vpack.i.bf16 %v341_v2, %v340_v1  ;;  %s2185_s22 = smov 112   ;;  %vm543_vm3 = vcmask 130048  }
  0x9c   : > { %vm2483_vm1 = vmpackc.low %vm352_vm0, %vm352_vm0  ;;  %v334_v5 = vld [vmem:[%s278_s19] sm:$0xff]  ;;  %v344_v6 = vand.u32 2147483647, %v330_v3  ;;  %v335_v8 = vld [vmem:[%s278_s19 + $0x8] sm:$0xff]  ;;  %v345_v11 = vand.u32 2147483647, %v331_v7 }
  0x9d   : > { %v346_v10 = vand.u32 2147483647, %v334_v5  ;;  %v347_v12 = vand.u32 2147483647, %v335_v8  ;;  %v1746_v13 = vpack.c.bf16 %v335_v8, %v334_v5  ;;  %1754 = vmatprep.subr.msk.bf16.mxu1 %vm2483_vm1, %v1752_v4  ;;  %v2491_v14 = vmul.f32 0.35355338, %v330_v3  ;;  %1889 = vrot.lane.b32.xlu0 %v2487_v9, %s2182_s13 }
  0x9e   : > { %1757 = vmatpush3.bf16.xpose.msk.msra.mxu1 %vm2483_vm1, %v1752_v4  ;;  %v2509_v19 = vmul.f32 0.35355338, %v331_v7  ;;  %v2515_v20 = vpack.i.bf16 %v335_v8, %v334_v5  ;;  %v338_v21 = vld [vmem:[%s287_s21] sm:$0xff]  ;;  %v339_v22 = vld [vmem:[%s287_s21 + $0x8] sm:$0xff]  ;;  %s2186_s10 = smov 104   ;;  %s2187_s5 = smov 8  }
  0x9f   : > { %v348_v15 = vadd.f32 %v346_v10, %v344_v6  ;;  %v349_v16 = vadd.f32 %v347_v12, %v345_v11  ;;  %1748 = vmatprep.subr.msk.bf16.mxu0 %vm2483_vm1, %v1746_v13  ;;  %1670 = vmatprep.mubr.msk.f32.mxu0 %vm352_vm0, %v2491_v14  ;;  %v2532_v25 = vpack.c.bf16 %v339_v22, %v338_v21  ;;  %s2188_s7 = smov 16   ;;  %s2189_s29 = smov 24   ;;  %vm1393_vm4 = vcmask 195584  }
  0xa0   : > { %1751 = vmatpush3.bf16.xpose.msk.msra.mxu0 %vm2483_vm1, %v1746_v13  ;;  %s325_s30 = scalar_lea.vmem [#allocation10], %s2462_s14  ;;  %vm1396_vm5 = vcmask 261120   ;;  %s1625_s1 = sshll.u32 %s2166_s18, 8 }
  0xa1   : > { %v2503_v17 = vmul.f32 0.35355338, %v348_v15  ;;  %v2505_v18 = vmul.f32 0.35355338, %v349_v16  ;;  %1680 = vmatprep.subr.bf16.mxu0 %v2183_v24  ;;  %s1415_s26 = sshll.u32 %s325_s30, 4  ;;  %s2644_s0 = scalar_lea.hbm %s2698_s4, %s1625_s1  ;;  %s2638_s26 = int_to_ptr.vmem [resolvable:$true] %s1415_s26 }
  0xa2   : > { %s1400_s18 = scalar_lea.sflag [#allocation4], %s2459_s11  ;;  %s2084_s17 = scalar_lea.vmem %s2638_s26, 256 }
  0xa3   : > { %1677 = vmatprep.mubr.msk.f32.mxu1 %vm352_vm0, %v2503_v17  ;;  %691 = vrot.lane.b32.xlu0 %v2503_v17, %s2182_s13  ;;  %p2085_p2 = scmp.ne.s32.totalorder %s2638_s26, %s2084_s17  ;;  %p2744_p13 = scmp.ne.s32.totalorder %s2727_s6, 0 }
  0xa4   : > { %693 = vrot.lane.b32.xlu1 %v2505_v18, %s2182_s13  ;;  %s2190_s12 = smov [#allocation10]  }
  0xa5   : > { %1678 = vmatmul.mubr.msk.f32.vlgmr.msra.gmra.mrb[0].mxu1 %vm352_vm0, %v2505_v18  ;;  %p2086_p11 = pnand %p2085_p2, %p2744_p13  ;;  %s2088_s14 = sshll.u32 %s2190_s12, 4  ;;  %s2089_s14 = int_to_ptr.vmem [resolvable:$false] %s2088_s14 }
  0xa6   : > { %s2090_s28 = scalar_lea.vmem %s2089_s14, 512  ;;  %p2091_p5 = scmp.lt.s32.totalorder %s2638_s26, %s2089_s14 }
  0xa7   : > { %1671 = vmatmul.mubr.msk.f32.vlgmr.msra.gmra.mrb[0].mxu0 %vm352_vm0, %v2509_v19  ;;  %599 = vrot.lane.b32.xlu0 %v2491_v14, %s2182_s13  ;;  %p2087_p0 = pneg %p2086_p11  ;;  %p2092_p10 = scmp.lt.s32.totalorder %s2090_s28, %s2084_s17 }
  0xa8   : > { %1894 = vrot.lane.b32.xlu1 %v2515_v20, %s2182_s13  ;;  %1682 = vmatprep.mubr.msk.bf16.mxu0 %vm2184_vm2, %v2183_v24 }
  0xa9   : > { %1681 = vmatpush3.bf16.msra.mxu0 %v2532_v25  ;;  %p2093_p7 = por %p2092_p10, %p2091_p5 }
  0xab   : > { %804 = vrot.lane.b32.xlu0 %v2532_v25, %s2182_s13  ;;  %p2094_p4 = pnand %p2093_p7, %p2087_p0 }
  0xac   : > { %601 = vrot.lane.b32.xlu1 %v2509_v19, %s2182_s13 }
  0xaf   : > { %947 = vrot.lane.b32.xlu0 %v2503_v17, %s2185_s22 }
  0xb0   : > { %1899 = vrot.lane.b32.xlu1 %v2487_v9, %s2185_s22 }
  0xb3   : > { %1904 = vrot.lane.b32.xlu0 %v2515_v20, %s2185_s22 }
  0xb4   : > { %949 = vrot.lane.b32.xlu1 %v2505_v18, %s2185_s22 }
  0xb7   : > { %857 = vrot.lane.b32.xlu0 %v2509_v19, %s2185_s22 }
  0xb8   : > { %855 = vrot.lane.b32.xlu1 %v2491_v14, %s2185_s22 }
  0xbb   : > { %1909 = vrot.lane.b32.xlu0 %v2487_v9, %s2186_s10 }
  0xbc   : > { %1059 = vrot.lane.b32.xlu1 %v2532_v25, %s2185_s22 }
  0xbf   : > { %1204 = vrot.lane.b32.xlu0 %v2505_v18, %s2186_s10 }
  0xc0   : > { %1202 = vrot.lane.b32.xlu1 %v2503_v17, %s2186_s10 }
  0xc3   : > { %1110 = vrot.lane.b32.xlu0 %v2491_v14, %s2186_s10 }
  0xc4   : > { %1914 = vrot.lane.b32.xlu1 %v2515_v20, %s2186_s10 }
  0xc7   : > { %1314 = vrot.lane.b32.xlu0 %v2532_v25, %s2186_s10 }
  0xc8   : > { %1112 = vrot.lane.b32.xlu1 %v2509_v19, %s2186_s10 }
 0x10f   : > { %v1890_v23 = vpop.permute.xlu0 %1889 }
 0x110   : > { %v1892_v26 = vunpack.i.h.bf16 %v1890_v23  ;;  %v1891_v27 = vunpack.i.l.bf16 %v1890_v23 }
 0x112   : > { %v1764_v28 = vpack.c.bf16 %v1892_v26, %v1891_v27 }
 0x114   : > { %1766 = vmatprep.subr.msk.bf16.mxu0 %vm2483_vm1, %v1764_v28 }
 0x115   : > { %v692_v30 = vpop.permute.xlu0 %691 }
 0x116   : > { %v694_v29 = vpop.permute.xlu1 %693 }
 0x119   : > { %v600_v32 = vpop.permute.xlu0 %599 }
 0x11a   : > { %v1895_v31 = vpop.permute.xlu1 %1894  ;;  %1690 = vmatprep.mubr.msk.f32.mxu1 %vm352_vm0, %v600_v32 }
 0x11b   : > { %v1897_v33 = vunpack.i.h.bf16 %v1895_v31  ;;  %v1896_v34 = vunpack.i.l.bf16 %v1895_v31 }
 0x11d   : > { %v1758_v35 = vpack.c.bf16 %v1897_v33, %v1896_v34  ;;  %v805_v55 = vpop.permute.xlu0 %804 }
 0x11e   : > { %v602_v36 = vpop.permute.xlu1 %601 }
 0x11f   : > { %1760 = vmatprep.subr.msk.bf16.mxu1 %vm2483_vm1, %v1758_v35 }
 0x120   : > { %1763 = vmatpush3.bf16.xpose.msk.msra.mxu1 %vm2483_vm1, %v1758_v35 }
 0x121   : > { %1700 = vmatprep.subr.bf16.mxu1 %v2183_v24  ;;  %v948_v60 = vpop.permute.xlu0 %947 }
 0x122   : > { %v1900_v56 = vpop.permute.xlu1 %1899 }
 0x123   : > { %v1902_v57 = vunpack.i.h.bf16 %v1900_v56  ;;  %v1901_v58 = vunpack.i.l.bf16 %v1900_v56 }
 0x125   : > { %v1776_v59 = vpack.c.bf16 %v1902_v57, %v1901_v58  ;;  %v1905_v62 = vpop.permute.xlu0 %1904 }
 0x126   : > { %v950_v61 = vpop.permute.xlu1 %949  ;;  %v1907_v1 = vunpack.i.h.bf16 %v1905_v62  ;;  %v1906_v2 = vunpack.i.l.bf16 %v1905_v62 }
 0x127   : > { %1691 = vmatmul.mubr.msk.f32.vlgmr.msra.gmra.mrb[2].mxu1 %vm352_vm0, %v602_v36 }
 0x128   : > { %1702 = vmatprep.mubr.msk.bf16.mxu1 %vm2184_vm2, %v2183_v24  ;;  %1701 = vmatpush3.bf16.msra.mxu1 %v805_v55  ;;  %v1770_v3 = vpack.c.bf16 %v1907_v1, %v1906_v2 }
 0x129   : > { %1778 = vmatprep.subr.msk.bf16.mxu1 %vm2483_vm1, %v1776_v59  ;;  %v858_v4 = vpop.permute.xlu0 %857 }
 0x12a   : > { %v856_v63 = vpop.permute.xlu1 %855 }
 0x12d   : > { %v1910_v10 = vpop.permute.xlu0 %1909 }
 0x12e   : > { %v1060_v5 = vpop.permute.xlu1 %1059  ;;  %v1912_v11 = vunpack.i.h.bf16 %v1910_v10  ;;  %v1911_v12 = vunpack.i.l.bf16 %v1910_v10 }
 0x130   : > { %v2587_v14 = vpack.c.bf16 %v1912_v11, %v1911_v12 }
 0x131   : > { %v1205_v36 = vpop.permute.xlu0 %1204 }
 0x132   : > { %v1203_v26 = vpop.permute.xlu1 %1202 }
 0x136   : > { %v1915_v27 = vpop.permute.xlu1 %1914 }
 0x178   : > { %v1679_v37 = vpop.f32.mrb[0].mxu1 }
 0x179   : > { %v519_v38 = vpop.f32.mrb[1].mxu1 }
 0x17a   : > { %v1672_v39 = vpop.f32.mrb[0].mxu0  ;;  %v528_v40 = vpack.c.bf16 %v1679_v37, %v519_v38  ;;  %v1111_v37 = vpop.permute.xlu0 %1110 }
 0x17b   : > { %v431_v41 = vpop.f32.mrb[1].mxu0  ;;  %v1113_v38 = vpop.permute.xlu1 %1112 }
 0x17c   : > { %v440_v42 = vpack.c.bf16 %v1672_v39, %v431_v41  ;;  %v1585_v43 = vmul.bf16 3216621497, %v528_v40 }
 0x17e   : > { %1918 = vpow.bf16 %v1585_v43  ;;  %v1315_v39 = vpop.permute.xlu0 %1314 }
 0x17f   : > { %1920 = vtanh.bf16 %v440_v42 }
 0x189   : > { %v1919_v44 = vpop.eup %1918 }
 0x18a   : > { %v534_v45 = vadd.bf16 1065369472, %v1919_v44  ;;  %v1921_v46 = vpop.eup %1920 }
 0x18c   : > { %1922 = vrcp.bf16 %v534_v45 }
 0x197   : > { %v1923_v47 = vpop.eup %1922 }
 0x198   : > { %v536_v48 = vmul.bf16 1065369472, %v1923_v47 }
 0x19a   : > { %v537_v49 = vmul.bf16 %v1921_v46, %v536_v48 }
 0x19c   : > { %v539_v50 = vmul.bf16 1069105081, %v537_v49 }
 0x19e   : > { %1924 = vpow.bf16 %v539_v50 }
 0x1a9   : > { %v2557_v51 = vpop.eup %1924 }
 0x1aa   : > { %1683 = vmatmul.mubr.msk.bf16.vlgmr.msra.gmra.mrb[4].mxu0 %vm543_vm3, %v2557_v51 }
 0x1ab   : > { %1769 = vmatpush3.bf16.xpose.msk.msra.mxu0 %vm2483_vm1, %v1764_v28  ;;  %1697 = vmatprep.mubr.msk.f32.mxu0 %vm352_vm0, %v692_v30  ;;  %v1917_v28 = vunpack.i.h.bf16 %v1915_v27 }
 0x1ac   : > { %1772 = vmatprep.subr.msk.bf16.mxu0 %vm2483_vm1, %v1770_v3 }
 0x1b2   : > { %1698 = vmatmul.mubr.msk.f32.vlgmr.msra.gmra.mrb[2].mxu0 %vm352_vm0, %v694_v29  ;;  %v1916_v29 = vunpack.i.l.bf16 %v1915_v27 }
 0x1b3   : > { %1710 = vmatprep.mubr.msk.f32.mxu0 %vm352_vm0, %v856_v63  ;;  %1775 = vmatpush3.bf16.xpose.msk.msra.mxu0 %vm2483_vm1, %v1770_v3 }
 0x1b4   : > { %1720 = vmatprep.subr.bf16.mxu0 %v2183_v24  ;;  %v1782_v30 = vpack.c.bf16 %v1917_v28, %v1916_v29 }
 0x1ba   : > { %1711 = vmatmul.mubr.msk.f32.vlgmr.msra.gmra.mrb[8].mxu0 %vm352_vm0, %v858_v4 }
 0x1bb   : > { %1721 = vmatpush3.bf16.msra.mxu0 %v1060_v5  ;;  %1722 = vmatprep.mubr.msk.bf16.mxu0 %vm2184_vm2, %v2183_v24 }
 0x1bc   : > { %1790 = vmatprep.subr.msk.bf16.mxu0 %vm2483_vm1, %v2587_v14 }
 0x1fa   : > { %v1692_v52 = vpop.f32.mrb[2].mxu1 }
 0x1fb   : > { %v681_v53 = vpop.f32.mrb[3].mxu1 }
 0x1fc   : > { %v690_v54 = vpack.c.bf16 %v1692_v52, %v681_v53 }
 0x27d   : > { %v2583_v6 = vpop.f32.mrb[4].mxu0 }
 0x27e   : > { %v1684_v7 = vpop.f32.mrb[5].mxu0 }
 0x27f   : > { %v2585_v8 = vpop.f32.mrb[6].mxu0 }
 0x280   : > { %v1685_v9 = vpop.f32.mrb[7].mxu0 }
 0x285   : > { %v1699_v13 = vpop.f32.mrb[2].mxu0 }
 0x286   : > { %v773_v15 = vpop.f32.mrb[3].mxu0 }
 0x287   : > { %v782_v16 = vpack.c.bf16 %v1699_v13, %v773_v15 }
 0x289   : > { %v1595_v17 = vmul.bf16 3216621497, %v782_v16 }
 0x28b   : > { %1926 = vpow.bf16 %v1595_v17 }
 0x28c   : > { %1928 = vtanh.bf16 %v690_v54 }
 0x28d   : > { %v1712_v40 = vpop.f32.mrb[8].mxu0 }
 0x28e   : > { %v937_v41 = vpop.f32.mrb[9].mxu0 }
 0x28f   : > { %v946_v42 = vpack.c.bf16 %v1712_v40, %v937_v41 }
 0x296   : > { %v1927_v18 = vpop.eup %1926 }
 0x297   : > { %v788_v19 = vadd.bf16 1065369472, %v1927_v18  ;;  %v1929_v20 = vpop.eup %1928 }
 0x299   : > { %1930 = vrcp.bf16 %v788_v19 }
 0x2a4   : > { %v1931_v21 = vpop.eup %1930 }
 0x2a5   : > { %v790_v22 = vmul.bf16 1065369472, %v1931_v21 }
 0x2a7   : > { %v791_v23 = vmul.bf16 %v1929_v20, %v790_v22 }
 0x2a9   : > { %v793_v25 = vmul.bf16 1069105081, %v791_v23 }
 0x2ab   : > { %1932 = vpow.bf16 %v793_v25  ;;  %v542_v25 = vunpack.c.h.bf16 %v2557_v51 }
 0x2ad   : > { %v547_v27 = vsel %vm543_vm3, %v542_v25, 0.0 }
 0x2b6   : > { %v1933_v31 = vpop.eup %1932 }
 0x2b7   : > { %1703 = vmatmul.mubr.msk.bf16.vlgmr.msra.gmra.mrb[4].mxu1 %vm543_vm3, %v1933_v31  ;;  %v796_v32 = vunpack.c.h.bf16 %v1933_v31  ;;  %v795_v33 = vunpack.c.l.bf16 %v1933_v31 }
 0x2b8   : > { %1781 = vmatpush3.bf16.xpose.msk.msra.mxu1 %vm2483_vm1, %v1776_v59  ;;  %1717 = vmatprep.mubr.msk.f32.mxu1 %vm352_vm0, %v948_v60 }
 0x2b9   : > { %v800_v34 = vsel %vm543_vm3, %v796_v32, 0.0  ;;  %v797_v35 = vsel %vm543_vm3, %v795_v33, 0.0  ;;  %1784 = vmatprep.subr.msk.bf16.mxu1 %vm2483_vm1, %v1782_v30 }
 0x2ba   : > { %801 = vadd.xlane.f32.xlu0 %v800_v34  ;;  %798 = vadd.xlane.f32.xlu1 %v797_v35 }
 0x2bf   : > { %1718 = vmatmul.mubr.msk.f32.vlgmr.msra.gmra.mrb[8].mxu1 %vm352_vm0, %v950_v61 }
 0x2c0   : > { %1787 = vmatpush3.bf16.xpose.msk.msra.mxu1 %vm2483_vm1, %v1782_v30  ;;  %1730 = vmatprep.mubr.msk.f32.mxu1 %vm352_vm0, %v1111_v37 }
 0x2c1   : > { %1740 = vmatprep.subr.bf16.mxu1 %v2183_v24 }
 0x2c7   : > { %1731 = vmatmul.mubr.msk.f32.vlgmr.msra.gmra.mrb[10].mxu1 %vm352_vm0, %v1113_v38 }
 0x2c8   : > { %1741 = vmatpush3.bf16.msra.mxu1 %v1315_v39  ;;  %1742 = vmatprep.mubr.msk.bf16.mxu1 %vm2184_vm2, %v2183_v24 }
 0x347   : > { %v802_v29 = vpop.xlane.xlu0 %801  ;;  %v799_v31 = vpop.xlane.xlu1 %798 }
 0x38a   : > { %v2608_v43 = vpop.f32.mrb[4].mxu1 }
 0x38b   : > { %v1704_v44 = vpop.f32.mrb[5].mxu1 }
 0x38c   : > { %v2610_v45 = vpop.f32.mrb[6].mxu1 }
 0x38d   : > { %v1705_v46 = vpop.f32.mrb[7].mxu1 }
 0x392   : > { %v1719_v47 = vpop.f32.mrb[8].mxu1 }
 0x393   : > { %v1029_v48 = vpop.f32.mrb[9].mxu1 }
 0x394   : > { %v1038_v49 = vpack.c.bf16 %v1719_v47, %v1029_v48 }
 0x396   : > { %v1605_v50 = vmul.bf16 3216621497, %v1038_v49 }
 0x398   : > { %1934 = vpow.bf16 %v1605_v50 }
 0x399   : > { %1936 = vtanh.bf16 %v946_v42 }
 0x39a   : > { %v1732_v63 = vpop.f32.mrb[10].mxu1 }
 0x39b   : > { %v1192_v1 = vpop.f32.mrb[11].mxu1 }
 0x39c   : > { %v1201_v2 = vpack.c.bf16 %v1732_v63, %v1192_v1 }
 0x3a3   : > { %v1935_v52 = vpop.eup %1934 }
 0x3a4   : > { %v1044_v53 = vadd.bf16 1065369472, %v1935_v52  ;;  %v1937_v54 = vpop.eup %1936 }
 0x3a6   : > { %1938 = vrcp.bf16 %v1044_v53 }
 0x3b1   : > { %v1939_v24 = vpop.eup %1938 }
 0x3b2   : > { %v1046_v55 = vmul.bf16 1065369472, %v1939_v24 }
 0x3b4   : > { %v1047_v56 = vmul.bf16 %v1937_v54, %v1046_v55 }
 0x3b6   : > { %v1049_v57 = vmul.bf16 1069105081, %v1047_v56 }
 0x3b8   : > { %1940 = vpow.bf16 %v1049_v57 }
 0x3c3   : > { %v1941_v58 = vpop.eup %1940 }
 0x3c4   : > { %1723 = vmatmul.mubr.msk.bf16.vlgmr.msra.gmra.mrb[12].mxu0 %vm543_vm3, %v1941_v58  ;;  %v1051_v59 = vunpack.c.l.bf16 %v1941_v58  ;;  %v1052_v60 = vunpack.c.h.bf16 %v1941_v58 }
 0x3c5   : > { %1793 = vmatpush3.bf16.xpose.msk.msra.mxu0 %vm2483_vm1, %v2587_v14  ;;  %1737 = vmatprep.mubr.msk.f32.mxu0 %vm352_vm0, %v1203_v26  ;;  %v541_v26 = vunpack.c.l.bf16 %v2557_v51 }
 0x3c6   : > { %v1053_v61 = vsel %vm543_vm3, %v1051_v59, 0.0  ;;  %v1056_v62 = vsel %vm543_vm3, %v1052_v60, 0.0 }
 0x3c7   : > { %1054 = vadd.xlane.f32.xlu0 %v1053_v61  ;;  %1057 = vadd.xlane.f32.xlu1 %v1056_v62  ;;  %v544_v28 = vsel %vm543_vm3, %v541_v26, 0.0 }
 0x3cc   : > { %1738 = vmatmul.mubr.msk.f32.vlgmr.msra.gmra.mrb[10].mxu0 %vm352_vm0, %v1205_v36 }
 0x454   : > { %v1055_v30 = vpop.xlane.xlu0 %1054  ;;  %v1058_v32 = vpop.xlane.xlu1 %1057 }
 0x497   : > { %v1099_v3 = vpop.f32.mrb[12].mxu0 }
 0x498   : > { %v1724_v4 = vpop.f32.mrb[13].mxu0 }
 0x499   : > { %v1102_v5 = vpop.f32.mrb[14].mxu0 }
 0x49a   : > { %v1725_v7 = vpop.f32.mrb[15].mxu0 }
 0x49f   : > { %v1739_v9 = vpop.f32.mrb[10].mxu0 }
 0x4a0   : > { %v1284_v0 = vpop.f32.mrb[11].mxu0 }
 0x4a1   : > { %v1293_v10 = vpack.c.bf16 %v1739_v9, %v1284_v0 }
 0x4a3   : > { %v1615_v11 = vmul.bf16 3216621497, %v1293_v10 }
 0x4a5   : > { %1942 = vpow.bf16 %v1615_v11 }
 0x4a6   : > { %1944 = vtanh.bf16 %v1201_v2 }
 0x4b0   : > { %v1943_v12 = vpop.eup %1942 }
 0x4b1   : > { %v1299_v13 = vadd.bf16 1065369472, %v1943_v12  ;;  %v1945_v14 = vpop.eup %1944 }
 0x4b3   : > { %1946 = vrcp.bf16 %v1299_v13 }
 0x4be   : > { %v1947_v15 = vpop.eup %1946 }
 0x4bf   : > { %v1301_v16 = vmul.bf16 1065369472, %v1947_v15 }
 0x4c1   : > { %v1302_v17 = vmul.bf16 %v1945_v14, %v1301_v16 }
 0x4c3   : > { %v1304_v18 = vmul.bf16 1069105081, %v1302_v17 }
 0x4c5   : > { %1948 = vpow.bf16 %v1304_v18 }
 0x4c6   : > { %1950 = vrcp.f32 %v802_v29 }
 0x4c7   : > { %1952 = vrcp.f32 %v1055_v30 }
 0x4c8   : > { %1954 = vrcp.f32 %v799_v31 }
 0x4c9   : > { %1956 = vrcp.f32 %v1058_v32 }
 0x4d0   : > { %v1949_v19 = vpop.eup %1948 }
 0x4d1   : > { %1743 = vmatmul.mubr.msk.bf16.vlgmr.msra.gmra.mrb[12].mxu1 %vm543_vm3, %v1949_v19  ;;  %v1306_v20 = vunpack.c.l.bf16 %v1949_v19  ;;  %v1307_v21 = vunpack.c.h.bf16 %v1949_v19  ;;  %v1951_v33 = vpop.eup %1950 }
 0x4d2   : > { %v854_v34 = vmul.f32 %v1951_v33, %v2610_v45  ;;  %v1953_v51 = vpop.eup %1952 }
 0x4d3   : > { %v1308_v22 = vsel %vm543_vm3, %v1306_v20, 0.0  ;;  %v1311_v23 = vsel %vm543_vm3, %v1307_v21, 0.0  ;;  %v1955_v35 = vpop.eup %1954  ;;  %v1108_v36 = vmul.f32 %v1953_v51, %v1099_v3 }
 0x4d4   : > { %1309 = vadd.xlane.f32.xlu0 %v1308_v22  ;;  %1312 = vadd.xlane.f32.xlu1 %v1311_v23  ;;  %v853_v37 = vmul.f32 %v1955_v35, %v2608_v43  ;;  %v1957_v38 = vpop.eup %1956 }
 0x4d5   : > { %v1109_v39 = vmul.f32 %v1957_v38, %v1102_v5 }
 0x4d8   : > { %548 = vadd.xlane.f32.xlu1 %v547_v27  ;;  %545 = vadd.xlane.f32.xlu0 %v544_v28 }
 0x4e9   : > { %1369 = vrot.lane.b32.xlu1 %v854_v34, %s2187_s5 }
 0x4ed   : > { %1375 = vrot.lane.b32.xlu1 %v1108_v36, %s2188_s7 }
 0x4ee   : > { %1367 = vrot.lane.b32.xlu0 %v853_v37, %s2187_s5 }
 0x4f2   : > { %1377 = vrot.lane.b32.xlu0 %v1109_v39, %s2188_s7 }
 0x561   : > { %v1310_v40 = vpop.xlane.xlu0 %1309  ;;  %v1313_v41 = vpop.xlane.xlu1 %1312 }
 0x562   : > { %1958 = vrcp.f32 %v1310_v40 }
 0x563   : > { %1960 = vrcp.f32 %v1313_v41 }
 0x565   : > { %v546_v43 = vpop.xlane.xlu0 %545  ;;  %v549_v52 = vpop.xlane.xlu1 %548 }
 0x566   : > { %1962 = vrcp.f32 %v546_v43 }
 0x567   : > { %1964 = vrcp.f32 %v549_v52 }
 0x569   : > { %v1370_v54 = vpop.permute.xlu1 %1369  ;;  %v1368_v55 = vpop.permute.xlu0 %1367 }
 0x56c   : > { %v1959_v42 = vpop.eup %1958 }
 0x56d   : > { %v1961_v47 = vpop.eup %1960  ;;  %v1376_v58 = vpop.permute.xlu1 %1375 }
 0x56e   : > { %v1378_v60 = vpop.permute.xlu0 %1377 }
 0x570   : > { %v1963_v53 = vpop.eup %1962 }
 0x571   : > { %v1965_v24 = vpop.eup %1964  ;;  %v597_v56 = vmul.f32 %v1963_v53, %v2583_v6 }
 0x572   : > { %v598_v57 = vmul.f32 %v1965_v24, %v2585_v8 }
 0x573   : > { %v1389_v59 = vsel %vm352_vm0, %v597_v56, %v1368_v55 }
 0x574   : > { %v1390_v61 = vsel %vm352_vm0, %v598_v57, %v1370_v54  ;;  %v1391_v62 = vsel %vm543_vm3, %v1389_v59, %v1376_v58 }
 0x575   : > { %v1392_v8 = vsel %vm543_vm3, %v1390_v61, %v1378_v60 }
 0x5a4   : > { %v1354_v44 = vpop.f32.mrb[12].mxu1 }
 0x5a5   : > { %v1363_v45 = vmul.f32 %v1959_v42, %v1354_v44  ;;  %v1744_v46 = vpop.f32.mrb[13].mxu1 }
 0x5a6   : > { %v1357_v48 = vpop.f32.mrb[14].mxu1 }
 0x5a7   : > { %v1364_v49 = vmul.f32 %v1961_v47, %v1357_v48  ;;  %v1745_v50 = vpop.f32.mrb[15].mxu1  ;;  %1383 = vrot.lane.b32.xlu1 %v1363_v45, %s2189_s29 }
 0x5a9   : > { %1385 = vrot.lane.b32.xlu0 %v1364_v49, %s2189_s29 }
 0x619   : > { %v1384_v63 = vpop.permute.xlu1 %1383 }
 0x61a   : > { %v1394_v6 = vsel %vm1393_vm4, %v1391_v62, %v1384_v63 }
 0x61b   : > { %1397 = vst.msk [vmem:[%s325_s30] sm:$0xff] %vm1396_vm5, %v1394_v6  ;;  %v1386_v1 = vpop.permute.xlu0 %1385 }
 0x61c   : > { %v1395_v2 = vsel %vm1393_vm4, %v1392_v8, %v1386_v1 }
 0x61d   : > { %1398 = vst.msk [vmem:[%s325_s30 + $0x8] sm:$0xff] %vm1396_vm5, %v1395_v2 }
 0x61e   : > { %2097 = shalt.err (!%p2094_p4)
}
 0x61f   : > { %s2098_s24 = scalar_lea.hbm %s2644_s0, 256  ;;  %s2102_s19 = scalar_lea.hbm %s2698_s4, 512 }
 0x620   : > { %p2099_p3 = scmp.ne.s32.totalorder %s2644_s0, %s2098_s24  ;;  %p2103_p8 = scmp.lt.u32.totalorder %s2644_s0, %s2698_s4 }
 0x621   : > { %p2104_p12 = scmp.lt.u32.totalorder %s2102_s19, %s2098_s24  ;;  %p2106_p2 = scmp.lt.u32.totalorder %s2098_s24, %s2644_s0 }
 0x622   : > { %p2100_p6 = pnand %p2099_p3, %p2744_p13 }
 0x623   : > { %p2105_p1 = por %p2104_p12, %p2103_p8 }
 0x624   : > { %p2101_p9 = pneg %p2100_p6 }
 0x625   : > { %p2107_p11 = por %p2106_p2, %p2105_p1 }
 0x627   : > { %p2108_p0 = pnand %p2107_p11, %p2101_p9 }
 0x629   : > { %2111 = shalt.err (!%p2108_p0)
}
 0x62a   : > { %s2191_s22 = smov 128  }
 0x62b   : > { %1804 = dma.vmem_to_hbm [thread:$0]  (%p2744_p13), %s2638_s26, 256, %s2644_s0, %s1400_s18, %s2191_s22, %s2191_s22, %s2187_s5  }
 0x62c PF: > { %s1430_s10 = sand.u32 1, %s2154_s15   ;;  %p2745_p5 = scmp.ne.s32.totalorder %s2728_s8, 0 }
 0x62d   : > { %p2746_p10 = scmp.ge.s32.totalorder %s2174_s20, 2  ;;  %s1431_s7 = scalar_lea.sflag [#allocation4], %s1430_s10 }
 0x62f   : > { %p1821_p7 = pnand %p2746_p10, %p2745_p5 }
 0x631   : > { %2149 = dma.done.wait (!%p1821_p7), %s1431_s7, 256  }
 0x632   : > { %2151 = vsyncadd (!%p1821_p7), %s1431_s7, 4294967040  ;;  %s24_s20 = sadd.s32 1, %s2174_s20   ;;  %s2747_s6 = sld [smem:[#allocation15_spill]] }
 0x633   : > { %p21_p4 = scmp.ge.s32.totalorder %s24_s20, 4   ;;  %s2748_s17 = sld [smem:[#allocation18_spill]] }
 0x634   : > { %s2749_s18 = sld [smem:[#allocation16_spill]]  ;;  %s2750_s19 = sld [smem:[#allocation17_spill]] }
 0x635   : > { %s2751_s15 = smov %s2158_s16  ;;  %23 = sbr.rel (!%p21_p4) target bundleno = 12 (0xc), region = 110 }
 0x638   : > { %s2752_s16 = smov %s2747_s6 }
 0x63c   :  { %1436 = vsyncpa [#allocation3], 1 }
 0x63d   :  { %1438 = vsyncpa [#allocation3 + $0x1], 1 }
 0x63e   :  { %1439 = vsyncpa [#allocation6], 1 }
 0x63f   :  { %1441 = vsyncpa [#allocation6 + $0x1], 1 }
 0x640   :  { %1442 = vsyncpa [#allocation9], 1 }
 0x641   :  { %1443 = vsyncpa [#allocation4], 1 }
 0x642   :  { %1445 = vsyncpa [#allocation4 + $0x1], 1 }

</bundles_post_ra>
